<compile_context>
chip_gen: v7x
topology: tpu7x:2x2x1
jax: 0.10.0
libtpu: 0.0.40
codegen_flags: <defaults>
</compile_context>

<pallas_src>
import jax
import jax.numpy as jnp
from jax.experimental import pallas as pl
from jax.experimental.pallas import tpu as pltpu


def _conv_layer_kernel(x_ref, w_ref, b_ref, o_ref, f_ref):
    # x_ref: (1, L, C)   one batch element
    # w_ref: (3, C, C)   conv taps, already (C_in -> C_out) oriented, BN-folded
    # b_ref: (1, C)      conv bias with BN folded in
    # o_ref: (1, L_out, C)
    # f_ref: (L, C)      VMEM scratch for the stride-1 window max
    L_out = o_ref.shape[1]

    x = x_ref[0]                                                   # (L, C)

    # Replicate-padded neighbours along L (== padding_mode='replicate', pad=1).
    x_prev = jnp.concatenate([x[:1, :], x[:-1, :]], axis=0)        # x[l-1], clamped
    x_next = jnp.concatenate([x[1:, :], x[-1:, :]], axis=0)        # x[l+1], clamped

    # Conv1d(k=3) + folded BatchNorm as three MXU matmuls, f32 accumulation.
    y = jnp.dot(x_prev, w_ref[0], preferred_element_type=jnp.float32)
    y = y + jnp.dot(x, w_ref[1], preferred_element_type=jnp.float32)
    y = y + jnp.dot(x_next, w_ref[2], preferred_element_type=jnp.float32)
    y = y + b_ref[...]                                             # (1,C) broadcast

    # MaxPool1d(kernel=3, stride=2, padding=1).
    # Stride-1 running max over 3-windows with replicate-clamped ends; since every
    # pooling window contains the genuine edge element, clamping gives exactly the
    # same max as PyTorch's implicit -inf padding.
    y_prev = jnp.concatenate([y[:1, :], y[:-1, :]], axis=0)
    y_next = jnp.concatenate([y[1:, :], y[-1:, :]], axis=0)
    f_ref[...] = jnp.maximum(jnp.maximum(y_prev, y), y_next)       # (L, C)

    # Stride-2 downsample straight from VMEM scratch (pooled[i] = f[2*i]).
    pooled = f_ref[pl.ds(0, L_out, 2), :]                          # (L_out, C)

    # ELU after pooling (monotone => identical to ELU-then-max), alpha = 1.
    neg = jnp.exp(jnp.minimum(pooled, 0.0)) - 1.0
    o_ref[0] = jnp.where(pooled > 0.0, pooled, neg).astype(o_ref.dtype)


def conv_layer_forward(x, conv_w, conv_b, gamma, beta, running_mean, running_var,
                       eps=1e-5):
    """ConvLayer forward: Conv1d(k=3, replicate pad) -> BatchNorm1d -> ELU -> MaxPool1d(3,2,1).

    x:      (B, L, C) float32, channels last (same convention the PyTorch module is called with)
    conv_w: (C, C, 3)  PyTorch Conv1d weight layout (out_ch, in_ch, k)
    conv_b, gamma, beta, running_mean, running_var: (C,)
    Returns (B, L_out, C) with L_out = (L - 1)//2 + 1.
    """
    B, L, C = x.shape
    C_out, C_in, K = conv_w.shape
    assert C_out == C and C_in == C and K == 3, "kernel specialised to window_size=3"
    L_out = (L - 1) // 2 + 1

    # Fold eval-mode BatchNorm1d into the conv weights/bias (tiny host-side arrays).
    # TODO(synk): training-mode BatchNorm (batch statistics over (B, L)) would need a
    # cross-batch reduction pass; eval-mode running-stat semantics are implemented here.
    scale = (gamma / jnp.sqrt(running_var + eps)).astype(jnp.float32)          # (C,)
    w_taps = jnp.transpose(conv_w, (2, 1, 0)).astype(jnp.float32)              # (K, C_in, C_out)
    w_taps = w_taps * scale[None, None, :]
    b_fold = ((conv_b - running_mean) * scale + beta).astype(jnp.float32)
    b_fold = b_fold.reshape(1, C)

    return pl.pallas_call(
        _conv_layer_kernel,
        out_shape=jax.ShapeDtypeStruct((B, L_out, C), x.dtype),
        grid=(B,),
        in_specs=[
            pl.BlockSpec((1, L, C), lambda b: (b, 0, 0)),     # one batch slice per step
            pl.BlockSpec((K, C, C), lambda b: (0, 0, 0)),     # weights: resident
            pl.BlockSpec((1, C), lambda b: (0, 0)),           # folded bias: resident
        ],
        out_specs=pl.BlockSpec((1, L_out, C), lambda b: (b, 0, 0)),
        scratch_shapes=[pltpu.VMEM((L, C), jnp.float32)],
        compiler_params=pltpu.CompilerParams(
            dimension_semantics=("parallel",)),               # megacore-shard the batch
    )(x, w_taps, b_fold)


def _reference(x, conv_w, conv_b, gamma, beta, running_mean, running_var, eps=1e-5):
    """Plain-JAX mirror of the PyTorch forward (eval-mode BatchNorm) for verification."""
    xt = jnp.transpose(x, (0, 2, 1))                                   # (B, C, L)
    xp = jnp.pad(xt, ((0, 0), (0, 0), (1, 1)), mode="edge")            # replicate pad
    y = jax.lax.conv_general_dilated(
        xp, conv_w, window_strides=(1,), padding="VALID",
        dimension_numbers=("NCH", "OIH", "NCH"),
        precision=jax.lax.Precision.HIGHEST)
    y = y + conv_b[None, :, None]
    y = (y - running_mean[None, :, None]) \
        * (gamma / jnp.sqrt(running_var + eps))[None, :, None] \
        + beta[None, :, None]
    y = jnp.where(y > 0, y, jnp.exp(jnp.minimum(y, 0.0)) - 1.0)        # ELU
    y = jax.lax.reduce_window(y, -jnp.inf, jax.lax.max,
                              window_dimensions=(1, 1, 3),
                              window_strides=(1, 1, 2),
                              padding=((0, 0), (0, 0), (1, 1)))        # MaxPool1d(3,2,1)
    return jnp.transpose(y, (0, 2, 1))                                 # (B, L_out, C)


if __name__ == "__main__":
    B, L, C = 2, 16, 32
    key = jax.random.PRNGKey(0)
    k1, k2, k3, k4, k5, k6, k7 = jax.random.split(key, 7)

    x = jax.random.normal(k1, (B, L, C), dtype=jnp.float32)
    conv_w = 0.2 * jax.random.normal(k2, (C, C, 3), dtype=jnp.float32)   # (out, in, k)
    conv_b = 0.1 * jax.random.normal(k3, (C,), dtype=jnp.float32)
    gamma = 1.0 + 0.1 * jax.random.normal(k4, (C,), dtype=jnp.float32)
    beta = 0.1 * jax.random.normal(k5, (C,), dtype=jnp.float32)
    running_mean = 0.1 * jax.random.normal(k6, (C,), dtype=jnp.float32)
    running_var = jax.nn.softplus(jax.random.normal(k7, (C,), dtype=jnp.float32)) + 0.5

    fwd = jax.jit(conv_layer_forward)
    out = fwd(x, conv_w, conv_b, gamma, beta, running_mean, running_var)
    out = jax.block_until_ready(out)

    ref = _reference(x, conv_w, conv_b, gamma, beta, running_mean, running_var)
    L_out = (L - 1) // 2 + 1
    assert out.shape == (B, L_out, C), out.shape
    max_err = float(jnp.max(jnp.abs(out - ref)))
    assert jnp.allclose(out, ref, atol=1e-4, rtol=1e-4), max_err

    print("KERNEL_OK")
</pallas_src>

<mosaic_0001>
module attributes {stable_mosaic.version = 11 : i64} {
  func.func @_conv_layer_kernel(%arg0: i32, %arg1: memref<1x16x32xf32, #tpu.memory_space<vmem>>, %arg2: memref<3x32x32xf32, #tpu.memory_space<vmem>>, %arg3: memref<1x32xf32, #tpu.memory_space<vmem>>, %arg4: memref<1x8x32xf32, #tpu.memory_space<vmem>>, %arg5: memref<16x32xf32, #tpu.memory_space<vmem>>) attributes {dimension_semantics = [#tpu.dimension_semantics<parallel>], iteration_bounds = array<i64: 2>, scalar_prefetch = 0 : i64, scratch_operands = 1 : i64, tpu.core_type = #tpu.core_type<tc>, window_params = [{transform_indices = @transform_0, window_bounds = array<i64: 1, 16, 32>}, {pipeline_mode = #tpu.pipeline_mode<synchronous>, transform_indices = @transform_1, window_bounds = array<i64: 3, 32, 32>}, {pipeline_mode = #tpu.pipeline_mode<synchronous>, transform_indices = @transform_2, window_bounds = array<i64: 1, 32>}, {transform_indices = @transform_3, window_bounds = array<i64: 1, 8, 32>}]} {
    %c0 = arith.constant 0 : index
    %c0_0 = arith.constant 0 : index
    %c0_1 = arith.constant 0 : index
    %0 = vector.load %arg1[%c0, %c0_0, %c0_1] : memref<1x16x32xf32, #tpu.memory_space<vmem>>, vector<1x16x32xf32>
    %1 = vector.shape_cast %0 : vector<1x16x32xf32> to vector<16x32xf32>
    %2 = vector.extract_strided_slice %1 {offsets = [0, 0], sizes = [1, 32], strides = [1, 1]} : vector<16x32xf32> to vector<1x32xf32>
    %3 = vector.extract_strided_slice %1 {offsets = [0, 0], sizes = [15, 32], strides = [1, 1]} : vector<16x32xf32> to vector<15x32xf32>
    %4 = tpu.concatenate %2, %3 in 0 : vector<1x32xf32>, vector<15x32xf32> -> vector<16x32xf32>
    %5 = vector.extract_strided_slice %1 {offsets = [1, 0], sizes = [15, 32], strides = [1, 1]} : vector<16x32xf32> to vector<15x32xf32>
    %6 = vector.extract_strided_slice %1 {offsets = [15, 0], sizes = [1, 32], strides = [1, 1]} : vector<16x32xf32> to vector<1x32xf32>
    %7 = tpu.concatenate %5, %6 in 0 : vector<15x32xf32>, vector<1x32xf32> -> vector<16x32xf32>
    %c0_2 = arith.constant 0 : index
    %c0_3 = arith.constant 0 : index
    %c0_4 = arith.constant 0 : index
    %8 = vector.load %arg2[%c0_2, %c0_3, %c0_4] : memref<3x32x32xf32, #tpu.memory_space<vmem>>, vector<1x32x32xf32>
    %9 = vector.shape_cast %8 : vector<1x32x32xf32> to vector<32x32xf32>
    %cst = arith.constant dense<0.000000e+00> : vector<16x32xf32>
    %10 = tpu.matmul %4, %9, %cst {dimension_numbers = #tpu.dot_dimension_numbers<[1], [0], [0], [1], [0, 0, 1, 1], [], []>} : vector<16x32xf32>, vector<32x32xf32>, vector<16x32xf32> -> vector<16x32xf32>
    %c1 = arith.constant 1 : index
    %c0_5 = arith.constant 0 : index
    %c0_6 = arith.constant 0 : index
    %11 = vector.load %arg2[%c1, %c0_5, %c0_6] : memref<3x32x32xf32, #tpu.memory_space<vmem>>, vector<1x32x32xf32>
    %12 = vector.shape_cast %11 : vector<1x32x32xf32> to vector<32x32xf32>
    %cst_7 = arith.constant dense<0.000000e+00> : vector<16x32xf32>
    %13 = tpu.matmul %1, %12, %cst_7 {dimension_numbers = #tpu.dot_dimension_numbers<[1], [0], [0], [1], [0, 0, 1, 1], [], []>} : vector<16x32xf32>, vector<32x32xf32>, vector<16x32xf32> -> vector<16x32xf32>
    %14 = arith.addf %10, %13 : vector<16x32xf32>
    %c2 = arith.constant 2 : index
    %c0_8 = arith.constant 0 : index
    %c0_9 = arith.constant 0 : index
    %15 = vector.load %arg2[%c2, %c0_8, %c0_9] : memref<3x32x32xf32, #tpu.memory_space<vmem>>, vector<1x32x32xf32>
    %16 = vector.shape_cast %15 : vector<1x32x32xf32> to vector<32x32xf32>
    %cst_10 = arith.constant dense<0.000000e+00> : vector<16x32xf32>
    %17 = tpu.matmul %7, %16, %cst_10 {dimension_numbers = #tpu.dot_dimension_numbers<[1], [0], [0], [1], [0, 0, 1, 1], [], []>} : vector<16x32xf32>, vector<32x32xf32>, vector<16x32xf32> -> vector<16x32xf32>
    %18 = arith.addf %14, %17 : vector<16x32xf32>
    %c0_11 = arith.constant 0 : index
    %c0_12 = arith.constant 0 : index
    %19 = vector.load %arg3[%c0_11, %c0_12] : memref<1x32xf32, #tpu.memory_space<vmem>>, vector<1x32xf32>
    %20 = vector.broadcast %19 : vector<1x32xf32> to vector<16x32xf32>
    %21 = arith.addf %18, %20 : vector<16x32xf32>
    %22 = vector.extract_strided_slice %21 {offsets = [0, 0], sizes = [1, 32], strides = [1, 1]} : vector<16x32xf32> to vector<1x32xf32>
    %23 = vector.extract_strided_slice %21 {offsets = [0, 0], sizes = [15, 32], strides = [1, 1]} : vector<16x32xf32> to vector<15x32xf32>
    %24 = tpu.concatenate %22, %23 in 0 : vector<1x32xf32>, vector<15x32xf32> -> vector<16x32xf32>
    %25 = vector.extract_strided_slice %21 {offsets = [1, 0], sizes = [15, 32], strides = [1, 1]} : vector<16x32xf32> to vector<15x32xf32>
    %26 = vector.extract_strided_slice %21 {offsets = [15, 0], sizes = [1, 32], strides = [1, 1]} : vector<16x32xf32> to vector<1x32xf32>
    %27 = tpu.concatenate %25, %26 in 0 : vector<15x32xf32>, vector<1x32xf32> -> vector<16x32xf32>
    %28 = arith.maximumf %24, %21 : vector<16x32xf32>
    %29 = arith.maximumf %28, %27 : vector<16x32xf32>
    %c0_13 = arith.constant 0 : index
    %c0_14 = arith.constant 0 : index
    %30 = vector.load %arg5[%c0_13, %c0_14] : memref<16x32xf32, #tpu.memory_space<vmem>>, vector<16x32xf32>
    tpu.vector_store %arg5[%c0_13, %c0_14], %29 {strides = array<i32>} : memref<16x32xf32, #tpu.memory_space<vmem>>, vector<16x32xf32>,
    %c0_15 = arith.constant 0 : index
    %c0_16 = arith.constant 0 : index
    %31 = tpu.strided_load %arg5[%c0_15, %c0_16] {strides = array<i32: 2, 1>} : memref<16x32xf32, #tpu.memory_space<vmem>>, vector<8x32xf32>
    %cst_17 = arith.constant 0.000000e+00 : f32
    %32 = vector.broadcast %cst_17 : f32 to vector<8x32xf32>
    %33 = arith.minimumf %31, %32 : vector<8x32xf32>
    %34 = math.exp %33 : vector<8x32xf32>
    %cst_18 = arith.constant 1.000000e+00 : f32
    %35 = vector.broadcast %cst_18 : f32 to vector<8x32xf32>
    %36 = arith.subf %34, %35 : vector<8x32xf32>
    %cst_19 = arith.constant 0.000000e+00 : f32
    %37 = vector.broadcast %cst_19 : f32 to vector<8x32xf32>
    %38 = arith.cmpf ogt, %31, %37 : vector<8x32xf32>
    %39 = arith.select %38, %31, %36 : vector<8x32xi1>, vector<8x32xf32>
    %c0_20 = arith.constant 0 : index
    %c0_21 = arith.constant 0 : index
    %c0_22 = arith.constant 0 : index
    %40 = vector.load %arg4[%c0_20, %c0_21, %c0_22] : memref<1x8x32xf32, #tpu.memory_space<vmem>>, vector<1x8x32xf32>
    %41 = vector.shape_cast %40 : vector<1x8x32xf32> to vector<8x32xf32>
    %42 = vector.shape_cast %39 : vector<8x32xf32> to vector<1x8x32xf32>
    tpu.vector_store %arg4[%c0_20, %c0_21, %c0_22], %42 {strides = array<i32>} : memref<1x8x32xf32, #tpu.memory_space<vmem>>, vector<1x8x32xf32>,
    return
  }
  func.func @transform_0(%arg0: i32) -> (i32, i32, i32) {
    %c0_i32 = arith.constant 0 : i32
    %c0_i32_0 = arith.constant 0 : i32
    %c0_i32_1 = arith.constant 0 : i32
    return %arg0, %c0_i32, %c0_i32_0 : i32, i32, i32
  }
  func.func @transform_1(%arg0: i32) -> (i32, i32, i32) {
    %c0_i32 = arith.constant 0 : i32
    %c0_i32_0 = arith.constant 0 : i32
    %c0_i32_1 = arith.constant 0 : i32
    %c0_i32_2 = arith.constant 0 : i32
    return %c0_i32, %c0_i32_0, %c0_i32_1 : i32, i32, i32
  }
  func.func @transform_2(%arg0: i32) -> (i32, i32) {
    %c0_i32 = arith.constant 0 : i32
    %c0_i32_0 = arith.constant 0 : i32
    %c0_i32_1 = arith.constant 0 : i32
    return %c0_i32, %c0_i32_0 : i32, i32
  }
  func.func @transform_3(%arg0: i32) -> (i32, i32, i32) {
    %c0_i32 = arith.constant 0 : i32
    %c0_i32_0 = arith.constant 0 : i32
    %c0_i32_1 = arith.constant 0 : i32
    return %arg0, %c0_i32, %c0_i32_0 : i32, i32, i32
  }
}

</mosaic_0001>

<bundles_post_ra>
// kernel: conv_layer_forward.1
= control target key start
LH: loop header
LB: loop body
LE: loop exit
PB: predicated region body
PF: predicated region fallthrough
CT: control target
= control target key end

     0   :  { %8 = vsyncpa [#allocation4], 0  ;;  %s940_s0 = inlined_call_operand.vmem [shape: f32[2,16,32], index: 0, kind: input, shape index: {}]   ;;  %s941_s1 = inlined_call_operand.vmem [shape: f32[3,32,32], index: 1, kind: input, shape index: {}]   ;;  %s942_s2 = inlined_call_operand.vmem [shape: f32[1,32], index: 2, kind: input, shape index: {}]   ;;  %s943_s3 = inlined_call_operand.hbm [shape: f32[2,8,32], index: 3, kind: output, shape index: {}]  }
   0x1   :  { %10 = vsyncpa [#allocation4 + $0x1], 0  ;;  %s784_s12 = smov 0   ;;  %s786_s13 = smov 0  }
   0x2   :  { %s788_s14 = smov 0   ;;  %s790_s15 = smov 0  }
   0x3 LB: > { %s805_s16 = sadd.s32 4294967295, %s761_s15   ;;  %s551_s17 = sadd.s32 4294967294, %s761_s15   ;;  %s761_s15 = sphi %s790_s15, %s949_s15   ;;  %s757_s14 = sphi %s788_s14, %s948_s14   ;;  %s753_s13 = sphi %s786_s13, %s947_s13   ;;  %s749_s12 = sphi %s784_s12, %s946_s12  }
   0x4   : > { %s809_s18 = sadd.s32 1, %s761_s15   ;;  %s91_s19 = sadd.s32 1, %s757_s14 }
   0x5   : > { %s88_s20 = ssub.s32 %s761_s15, %s809_s18  ;;  %p101_p0 = scmp.ne.s32.totalorder %s757_s14, %s753_s13 }
   0x6   : > { %p89_p1 = scmp.eq.s32.totalorder %s88_s20, 0  ;;  %p102_p2 = scmp.eq.s32.totalorder %s805_s16, 1 }
   0x7   : > { %p107_p3 = scmp.ne.s32.totalorder %s753_s13, %s749_s12  ;;  %p108_p4 = scmp.eq.s32.totalorder %s551_s17, 1 }
   0x8   : > { %s820_s21 = scalar_select %p89_p1, %s757_s14, %s91_s19  }
   0x9   : > { %p822_p5 = por %p102_p2, %p101_p0  ;;  %p826_p6 = por %p108_p4, %p107_p3 }
   0xa   : > { %p554_p7 = scmp.ge.s32.totalorder %s761_s15, 1  ;;  %p140_p8 = scmp.lt.s32.totalorder %s761_s15, 3 }
   0xc   : > { %p141_p9 = pnand %p554_p7, %p140_p8 }
   0xd   : > { %v185_v0 = vld [vmem:[%s941_s1] sm:$0xff] (!%p141_p9)  ;;  %v186_v1 = vld [vmem:[%s941_s1 + $0x8] sm:$0xff] (!%p141_p9)  ;;  %v187_v2 = vld [vmem:[%s941_s1 + $0x10] sm:$0xff] (!%p141_p9)  ;;  %p164_p10 = scmp.lt.s32.totalorder (!%p141_p9), %s805_s16, 1  ;;  %vm173_vm0 = vcmask (!%p141_p9), 1040384   ;;  %vm194_vm1 = vcmask (!%p141_p9), 261120  }
   0xe   : > { %144 = sbr.rel (%p141_p9) target bundleno = 302 (0x12e), region = 32  ;;  %v638_v3 = vpack.c.bf16 (!%p141_p9), %v186_v1, %v185_v0  ;;  %v188_v4 = vld [vmem:[%s941_s1 + $0x18] sm:$0xff] (!%p141_p9)  ;;  %v558_v5 = vld [vmem:[%s941_s1 + $0x20] sm:$0xff] (!%p141_p9)  ;;  %v559_v6 = vld [vmem:[%s941_s1 + $0x28] sm:$0xff] (!%p141_p9)  ;;  %vm179_vm2 = vcmask (!%p141_p9), 1046528   ;;  %s161_s10 = sand.u32 (!%p141_p9), 1, %s753_s13  }
   0xf   : > { %v642_v7 = vpack.c.bf16 (!%p141_p9), %v188_v4, %v187_v2  ;;  %v630_v8 = vpack.c.bf16 (!%p141_p9), %v559_v6, %v558_v5  ;;  %v566_v9 = vld [vmem:[%s941_s1 + $0x40] sm:$0xff] (!%p141_p9)  ;;  %v567_v10 = vld [vmem:[%s941_s1 + $0x48] sm:$0xff] (!%p141_p9)  ;;  %v560_v11 = vld [vmem:[%s941_s1 + $0x30] sm:$0xff] (!%p141_p9)  ;;  %s555_s11 = sshll.u32 (!%p141_p9), %s161_s10, 3  ;;  %s575_s17 = sshll.u32 (!%p141_p9), %s805_s16, 7 }
  0x10   : > { %639 = vmatprep.subr.bf16.mxu0 (!%p141_p9), %v638_v3  ;;  %v561_v12 = vld [vmem:[%s941_s1 + $0x38] sm:$0xff] (!%p141_p9)  ;;  %v646_v14 = vpack.c.bf16 (!%p141_p9), %v567_v10, %v566_v9  ;;  %v568_v15 = vld [vmem:[%s941_s1 + $0x50] sm:$0xff] (!%p141_p9)  ;;  %v572_v31 = vld [vmem:[%s942_s2] ss:$0 sm:$0xff] (!%p141_p9)  ;;  %s163_s19 = scalar_lea.vmem (!%p141_p9), [#allocation3], %s555_s11  ;;  %s897_s26 = scalar_lea.hbm (!%p141_p9), %s943_s3, %s575_s17 }
  0x11   : > { %641 = vmatpush3.bf16.msra.mxu0 (!%p141_p9), %v638_v3  ;;  %631 = vmatprep.subr.bf16.mxu1 (!%p141_p9), %v630_v8  ;;  %v634_v13 = vpack.c.bf16 (!%p141_p9), %v561_v12, %v560_v11  ;;  %v569_v16 = vld [vmem:[%s941_s1 + $0x58] sm:$0xff] (!%p141_p9)  ;;  %s492_s20 = sshll.u32 (!%p141_p9), %s163_s19, 4  ;;  %s763_s28 = smov (!%p141_p9), [#allocation3]   ;;  %s899_s20 = int_to_ptr.vmem [resolvable:$true] %s492_s20 }
  0x12   : > { %643 = vmatprep.subr.bf16.mxu0 (!%p141_p9), %v642_v7  ;;  %633 = vmatpush3.bf16.msra.mxu1 (!%p141_p9), %v630_v8  ;;  %v650_v23 = vpack.c.bf16 (!%p141_p9), %v569_v16, %v568_v15  ;;  %s703_s29 = sshll.u32 (!%p141_p9), %s763_s28, 4  ;;  %s704_s29 = int_to_ptr.vmem [resolvable:$false] %s703_s29 }
  0x13   : > { %635 = vmatprep.subr.bf16.mxu1 (!%p141_p9), %v634_v13  ;;  %p706_p0 = scmp.lt.s32.totalorder (!%p141_p9), %s899_s20, %s704_s29 }
  0x15   : > { %s165_s9 = scalar_select %p164_p10, %s805_s16, 1  ;;  %645 = vmatpush3.bf16.msra.mxu0 %v642_v7 }
  0x16   : > { %647 = vmatprep.subr.bf16.mxu0 %v646_v14  ;;  %637 = vmatpush3.bf16.msra.mxu1 %v634_v13  ;;  %s699_s16 = scalar_lea.vmem %s899_s20, 128 }
  0x17   : > { %s578_s27 = sshll.u32 %s165_s9, 4  ;;  %p700_p11 = scmp.ne.s32.totalorder %s899_s20, %s699_s16 }
  0x18   : > { %s168_s30 = scalar_lea.vmem %s940_s0, %s578_s27  ;;  %s479_s27 = scalar_lea.sflag [#allocation4], %s161_s10 }
  0x19   : > { %v169_v17 = vld [vmem:[%s168_s30] sm:$0xff]  ;;  %v170_v18 = vld [vmem:[%s168_s30 + $0x8] sm:$0xff]  ;;  %p701_p12 = pnand %p700_p11, %p822_p5  ;;  %s705_s30 = scalar_lea.vmem %s704_s29, 256 }
  0x1a   : > { %v174_v19 = vrot.slane %v169_v17, 7  ;;  %v175_v20 = vrot.slane %v170_v18, 7  ;;  %605 = vmatprep.mubr.msk.f32.mxu1 %vm194_vm1, %v169_v17  ;;  %v180_v21 = vrot.slane %v169_v17, 1  ;;  %v181_v22 = vrot.slane %v170_v18, 1  ;;  %p707_p1 = scmp.lt.s32.totalorder %s705_s30, %s699_s16 }
  0x1b   : > { %606 = vmatmul.mubr.msk.f32.vlgmr.msra.gmra.mrb[0].mxu1 %vm194_vm1, %v170_v18  ;;  %p702_p13 = pneg %p701_p12 }
  0x1c   : > { %v178_v24 = vsel %vm173_vm0, %v169_v17, %v174_v19  ;;  %v176_v25 = vsel %vm173_vm0, %v174_v19, %v175_v20  ;;  %v182_v26 = vsel %vm179_vm2, %v180_v21, %v181_v22  ;;  %v184_v27 = vsel %vm179_vm2, %v181_v22, %v170_v18  ;;  %p708_p2 = por %p707_p1, %p706_p0 }
  0x1d   : > { %616 = vmatprep.mubr.msk.f32.mxu0 %vm194_vm1, %v178_v24 }
  0x1e   : > { %617 = vmatmul.mubr.msk.f32.vlgmr.msra.gmra.mrb[0].mxu0 %vm194_vm1, %v176_v25  ;;  %p709_p3 = pnand %p708_p2, %p702_p13 }
  0x1f   : > { %649 = vmatpush3.bf16.msra.mxu0 %v646_v14  ;;  %627 = vmatprep.mubr.msk.f32.mxu0 %vm194_vm1, %v182_v26 }
  0x20   : > { %651 = vmatprep.subr.bf16.mxu0 %v650_v23 }
  0x23   : > { %653 = vmatpush3.bf16.msra.mxu0 %v650_v23 }
  0x26   : > { %628 = vmatmul.mubr.msk.f32.vlgmr.msra.gmra.mrb[0].mxu0 %vm194_vm1, %v184_v27 }
  0xee   : > { %v607_v28 = vpop.f32.mrb[0].mxu1 }
  0xef   : > { %v265_v29 = vpop.f32.mrb[1].mxu1 }
  0xf9   : > { %v629_v30 = vpop.f32.mrb[0].mxu0 }
  0xfa   : > { %v654_v32 = vadd.f32 %v629_v30, %v607_v28  ;;  %v430_v33 = vpop.f32.mrb[1].mxu0 }
  0xfb   : > { %v655_v34 = vadd.f32 %v430_v33, %v265_v29 }
  0xfc   : > { %v449_v35 = vadd.f32 %v654_v32, %v572_v31 }
  0xfd   : > { %v448_v36 = vadd.f32 %v655_v34, %v572_v31 }
  0xfe   : > { %v453_v37 = vrot.slane %v449_v35, 7  ;;  %v459_v38 = vrot.slane %v449_v35, 1 }
  0xff   : > { %v452_v39 = vrot.slane %v448_v36, 7  ;;  %v458_v40 = vrot.slane %v448_v36, 1 }
 0x100   : > { %v463_v46 = vsel %vm179_vm2, %v459_v38, %v449_v35 }
 0x101   : > { %v454_v41 = vsel %vm173_vm0, %v452_v39, %v453_v37  ;;  %v457_v42 = vsel %vm173_vm0, %v448_v36, %v452_v39  ;;  %v460_v43 = vsel %vm179_vm2, %v458_v40, %v459_v38 }
 0x102   : > { %v464_v44 = vmax.f32 %v457_v42, %v448_v36  ;;  %v465_v45 = vmax.f32 %v454_v41, %v449_v35 }
 0x104   : > { %v466_v47 = vmax.f32 %v464_v44, %v460_v43  ;;  %v467_v48 = vmax.f32 %v465_v45, %v463_v46 }
 0x106   : > { %468 = vst.msk [vmem:[#allocation2] sm:$0xff] %vm194_vm1, %v466_v47  ;;  %469 = vst.msk [vmem:[#allocation2 + $0x8] sm:$0xff] %vm194_vm1, %v467_v48 }
 0x10d   : > { %v470_v49 = vld [vmem:[#allocation2] ss:$2 sm:$0xff] }
 0x10e   : > { %v471_v50 = vmin.f32 %v470_v49, 0.0  ;;  %vm475_vm3 = vcmp.gt.f32.partialorder %v470_v49, 0.0 }
 0x110   : > { %v472_v51 = vmul.f32 1.442695, %v471_v50 }
 0x112   : > { %697 = vpow2.f32 %v472_v51 }
 0x11c   : > { %v698_v52 = vpop.eup %697 }
 0x11d   : > { %v573_v53 = vadd.f32 -1.0, %v698_v52 }
 0x11f   : > { %v476_v54 = vsel %vm475_vm3, %v470_v49, %v573_v53 }
 0x120   : > { %477 = vst.msk [vmem:[%s163_s19] sm:$0xff] %vm194_vm1, %v476_v54 }
 0x121   : > { %712 = shalt.err (!%p709_p3)
}
 0x122   : > { %s713_s4 = scalar_lea.hbm %s897_s26, 128  ;;  %s717_s7 = scalar_lea.hbm %s943_s3, 256 }
 0x123   : > { %p714_p4 = scmp.ne.s32.totalorder %s897_s26, %s713_s4  ;;  %p718_p9 = scmp.lt.u32.totalorder %s897_s26, %s943_s3 }
 0x124   : > { %p719_p10 = scmp.lt.u32.totalorder %s717_s7, %s713_s4  ;;  %p721_p12 = scmp.lt.u32.totalorder %s713_s4, %s897_s26 }
 0x125   : > { %p715_p7 = pnand %p714_p4, %p822_p5 }
 0x126   : > { %p720_p11 = por %p719_p10, %p718_p9 }
 0x127   : > { %p716_p8 = pneg %p715_p7 }
 0x128   : > { %p722_p13 = por %p721_p12, %p720_p11 }
 0x12a   : > { %p723_p0 = pnand %p722_p13, %p716_p8 }
 0x12c   : > { %726 = shalt.err (!%p723_p0)
}
 0x12d   : > { %658 = dma.vmem_to_hbm [thread:$0]  (%p822_p5), %s899_s20, 128, %s897_s26, %s479_s27  }
 0x12e PF: > { %p664_p1 = scmp.ge.s32.totalorder %s761_s15, 2  ;;  %s504_s10 = sand.u32 1, %s749_s12  }
 0x12f   : > { %s505_s11 = scalar_lea.sflag [#allocation4], %s504_s10 }
 0x130   : > { %p661_p2 = pnand %p664_p1, %p826_p6 }
 0x132   : > { %744 = dma.done.wait (!%p661_p2), %s505_s11, 128  }
 0x133   : > { %746 = vsyncadd (!%p661_p2), %s505_s11, 4294967168  ;;  %p13_p3 = scmp.ge.s32.totalorder %s809_s18, 4   ;;  %s946_s12 = smov %s753_s13 }
 0x134   : > { %s947_s13 = smov %s757_s14  ;;  %s948_s14 = smov %s820_s21 }
 0x135   : > { %s949_s15 = smov %s809_s18  ;;  %15 = sbr.rel (!%p13_p3) target bundleno = 3 (0x3), region = 69 }
 0x13c   :  { %510 = vsyncpa [#allocation4], 1 }
 0x13d   :  { %512 = vsyncpa [#allocation4 + $0x1], 1 }

</bundles_post_ra>
